<compile_context>
chip_gen: v7x
topology: tpu7x:2x2x1
jax: 0.10.0
libtpu: 0.0.40
codegen_flags: <defaults>
</compile_context>

<pallas_src>
import jax
import jax.numpy as jnp
from jax.experimental import pallas as pl
from jax.experimental.pallas import tpu as pltpu

LANE = 128  # pad every feature dim to this (lane width)


def _round_up(n, m):
    return ((n + m - 1) // m) * m


def _pad2d(x, rows, cols):
    r, c = x.shape
    return jnp.pad(x, ((0, rows - r), (0, cols - c)))


def _pick_tile(n, cap=512):
    """Largest tile in {512, 256, 128} that divides n (n is a multiple of 128)."""
    for t in (512, 256, 128):
        if t <= cap and n % t == 0:
            return t
    return n


# ----------------------------------------------------------------------------
# Pallas kernels
# ----------------------------------------------------------------------------

def gcn_layer_kernel(tbl_ref, a_ref, x_ref, w_ref, b_ref, o_ref, acc_ref):
    """One (row-tile, k-block) step of  out = relu((A_hat @ X) @ W + b).

    tbl_ref is the scalar-prefetched nonzero-block table (used only by the
    index_maps).  acc_ref is a (tm, c_in) f32 accumulator of A_hat @ X.
    """
    k = pl.program_id(1)

    @pl.when(k == 0)
    def _init():
        acc_ref[...] = jnp.zeros_like(acc_ref)

    # Pure A_hat @ X accumulation over nonzero node blocks (f32 accumulator).
    acc_ref[...] += jnp.dot(a_ref[...], x_ref[...],
                            preferred_element_type=jnp.float32)

    @pl.when(k == pl.num_programs(1) - 1)
    def _finalize():
        # Apply the weight, bias and ReLU once per row tile.
        ax = acc_ref[...].astype(jnp.bfloat16)
        out = jnp.dot(ax, w_ref[...], preferred_element_type=jnp.float32)
        o_ref[...] = jnp.maximum(out + b_ref[...], 0.0).astype(o_ref.dtype)


def head_kernel(p_ref, h_ref, w1_ref, b1_ref, w2_ref, b2_ref, o_ref, pool_acc):
    """global_mean_pool (P @ H, tiled over nodes) -> lin1 -> lin2."""
    k = pl.program_id(0)

    @pl.when(k == 0)
    def _init():
        pool_acc[...] = jnp.zeros_like(pool_acc)

    pool_acc[...] += jnp.dot(p_ref[...], h_ref[...],
                             preferred_element_type=jnp.float32)

    @pl.when(k == pl.num_programs(0) - 1)
    def _finalize():
        pooled = pool_acc[...].astype(jnp.bfloat16)
        h1 = jnp.dot(pooled, w1_ref[...], preferred_element_type=jnp.float32)
        h1 = h1 + b1_ref[...]
        h2 = jnp.dot(h1.astype(jnp.bfloat16), w2_ref[...],
                     preferred_element_type=jnp.float32)
        o_ref[...] = h2 + b2_ref[...]


# ----------------------------------------------------------------------------
# pallas_call wrappers
# ----------------------------------------------------------------------------

_COMPILER_PARAMS_2D = pltpu.CompilerParams(
    dimension_semantics=("parallel", "arbitrary"),
    vmem_limit_bytes=32 * 1024 * 1024,  # conservative: fits v7x's 64 MiB VMEM
)
_COMPILER_PARAMS_1D = pltpu.CompilerParams(
    dimension_semantics=("arbitrary",),
    vmem_limit_bytes=32 * 1024 * 1024,
)


def nonzero_block_table(a_hat_pad, tm, tk):
    """Per row tile: the k-tile indices whose A_hat block is nonzero.

    Returns an (n_row_tiles, max_k) int32 table.  Entries beyond a row's count
    point at all-zero blocks of that row (argsort gives a permutation), so the
    padded contraction steps contribute exactly zero and never double-count.
    """
    n = a_hat_pad.shape[0]
    n_i, n_k = n // tm, n // tk
    blocks = a_hat_pad.reshape(n_i, tm, n_k, tk)
    nz = jnp.any(blocks != 0, axis=(1, 3))                       # (n_i, n_k)
    max_k = max(int(jnp.max(jnp.sum(nz, axis=1))), 1)
    order = jnp.argsort(jnp.where(nz, 0, 1).astype(jnp.int32), axis=1)
    return order[:, :max_k].astype(jnp.int32), max_k


def gcn_layer(a_hat, x, w, b, kblocks, *, tm, tk):
    """Fused GCNConv layer on padded bf16 inputs: relu((A_hat @ X) @ W + b)."""
    n = a_hat.shape[0]
    c_in = x.shape[1]
    c_out = w.shape[1]
    assert n % tm == 0 and n % tk == 0, "node dim must be padded to tile size"
    n_i = n // tm
    max_k = kblocks.shape[1]

    return pl.pallas_call(
        gcn_layer_kernel,
        out_shape=jax.ShapeDtypeStruct((n, c_out), jnp.bfloat16),
        grid_spec=pltpu.PrefetchScalarGridSpec(
            num_scalar_prefetch=1,                 # kblocks -> SMEM
            grid=(n_i, max_k),
            in_specs=[
                # A_hat tile: only nonzero blocks of this row tile are visited.
                pl.BlockSpec((tm, tk), lambda i, k, tbl: (i, tbl[i, k])),
                # Matching X k-slab.
                pl.BlockSpec((tk, c_in), lambda i, k, tbl: (tbl[i, k], 0)),
                pl.BlockSpec((c_in, c_out), lambda i, k, tbl: (0, 0)),  # W (resident)
                pl.BlockSpec((1, c_out), lambda i, k, tbl: (0, 0)),     # bias (resident)
            ],
            out_specs=pl.BlockSpec((tm, c_out), lambda i, k, tbl: (i, 0)),
            scratch_shapes=[pltpu.VMEM((tm, c_in), jnp.float32)],
        ),
        compiler_params=_COMPILER_PARAMS_2D,
    )(kblocks, a_hat, x, w, b)


def gcn_head(pool_mat, h, w1, b1, w2, b2, *, tk):
    """global_mean_pool -> lin1 -> lin2, pooling contraction tiled over nodes."""
    g, n = pool_mat.shape
    c = h.shape[1]
    c_hid = w1.shape[1]
    c_out = w2.shape[1]
    assert n % tk == 0

    return pl.pallas_call(
        head_kernel,
        out_shape=jax.ShapeDtypeStruct((g, c_out), jnp.float32),
        grid_spec=pltpu.PrefetchScalarGridSpec(
            num_scalar_prefetch=0,
            grid=(n // tk,),
            in_specs=[
                pl.BlockSpec((g, tk), lambda k: (0, k)),         # pooling matrix tile
                pl.BlockSpec((tk, c), lambda k: (k, 0)),         # H k-slab
                pl.BlockSpec((c, c_hid), lambda k: (0, 0)),      # lin1 W
                pl.BlockSpec((1, c_hid), lambda k: (0, 0)),      # lin1 b
                pl.BlockSpec((c_hid, c_out), lambda k: (0, 0)),  # lin2 W
                pl.BlockSpec((1, c_out), lambda k: (0, 0)),      # lin2 b
            ],
            out_specs=pl.BlockSpec((g, c_out), lambda k: (0, 0)),
            scratch_shapes=[pltpu.VMEM((g, c), jnp.float32)],
        ),
        compiler_params=_COMPILER_PARAMS_1D,
    )(pool_mat, h, w1, b1, w2, b2)


# ----------------------------------------------------------------------------
# Plain-JAX glue: graph preprocessing + parameter init + full forward
# ----------------------------------------------------------------------------

def build_normalized_adjacency(edge_index, num_nodes):
    """A_hat = D^-1/2 (A + I) D^-1/2  (GCNConv default: add_self_loops, normalize)."""
    src, dst = edge_index[0], edge_index[1]
    adj = jnp.zeros((num_nodes, num_nodes), jnp.float32)
    adj = adj.at[src, dst].add(1.0)
    adj = adj + jnp.eye(num_nodes, dtype=jnp.float32)
    deg = adj.sum(axis=1)
    d_inv_sqrt = jnp.where(deg > 0, 1.0 / jnp.sqrt(deg), 0.0)
    return d_inv_sqrt[:, None] * adj * d_inv_sqrt[None, :]


def build_mean_pool_matrix(batch, num_graphs):
    onehot = (batch[None, :] == jnp.arange(num_graphs)[:, None]).astype(jnp.float32)
    counts = jnp.maximum(onehot.sum(axis=1, keepdims=True), 1.0)
    return onehot / counts


def init_params(key, n_in, n_hidden, n_out):
    dims = [
        ("conv1", n_in, n_hidden),
        ("conv2", n_hidden, n_hidden),
        ("conv3", n_hidden, n_hidden),
        ("conv4", n_hidden, n_hidden),
        ("conv5", n_hidden, 2 * n_hidden),
        ("lin1", 2 * n_hidden, n_hidden),
        ("lin2", n_hidden, n_out),
    ]
    params = {}
    for name, cin, cout in dims:
        key, kw, kb = jax.random.split(key, 3)
        scale = 1.0 / jnp.sqrt(jnp.float32(cin))
        w = jax.random.uniform(kw, (cin, cout), jnp.float32, -scale, scale)
        b = jax.random.uniform(kb, (1, cout), jnp.float32, -scale, scale)
        cin_p = _round_up(cin, LANE)
        cout_p = _round_up(cout, LANE)
        params[name] = {
            # weights bf16 (MXU-native), zero-padded to lane-dense shapes
            "w": _pad2d(w, cin_p, cout_p).astype(jnp.bfloat16),
            # bias stays f32 (added to the f32 accumulator)
            "b": _pad2d(b, 1, cout_p),
        }
    return params


def gcn_forward(params, x_pad, a_hat_pad, pool_pad, *, tm=512, tk=512):
    n = a_hat_pad.shape[0]
    tm = _pick_tile(n, tm)
    tk = _pick_tile(n, tk)
    # Block-sparsity table (shared by all 5 layers; A_hat is block-diagonal
    # over the batched graphs).  Host-side preprocessing, eager.
    kblocks, _ = nonzero_block_table(a_hat_pad, tm, tk)

    # 5x (GCNConv -> ReLU -> Dropout[eval = identity]) fused, tiled Pallas layers.
    # NOTE: padded node rows come out of each layer as relu(bias) (nonzero); this
    # is benign because the padded columns of A_hat and pool_mat are zero.
    h = x_pad
    for name in ("conv1", "conv2", "conv3", "conv4", "conv5"):
        p = params[name]
        h = gcn_layer(a_hat_pad, h, p["w"], p["b"], kblocks, tm=tm, tk=tk)

    # global_mean_pool -> lin1 -> lin2 in one small fused, tiled Pallas kernel.
    return gcn_head(
        pool_pad, h,
        params["lin1"]["w"], params["lin1"]["b"],
        params["lin2"]["w"], params["lin2"]["b"],
        tk=tk,
    )


def reference_forward(params, x_pad, a_hat_pad, pool_pad):
    """Plain-JAX f32 reference on the same (padded, bf16-rounded) inputs."""
    a = a_hat_pad.astype(jnp.float32)
    h = x_pad
    for name in ("conv1", "conv2", "conv3", "conv4", "conv5"):
        w = params[name]["w"].astype(jnp.float32)
        b = params[name]["b"]
        h = jnp.maximum(a @ (h.astype(jnp.float32) @ w) + b, 0.0).astype(jnp.bfloat16)
    pooled = pool_pad.astype(jnp.float32) @ h.astype(jnp.float32)
    h1 = pooled @ params["lin1"]["w"].astype(jnp.float32) + params["lin1"]["b"]
    return h1 @ params["lin2"]["w"].astype(jnp.float32) + params["lin2"]["b"]


# ----------------------------------------------------------------------------
# Main
# ----------------------------------------------------------------------------

if __name__ == "__main__":
    # Small, deterministic synthetic graph batch:
    #   2 graphs, 8 nodes each (16 nodes total), ring edges within each graph.
    N_NODES = 16
    N_GRAPHS = 2
    N_IN = 4
    N_HIDDEN = 32
    N_OUT = 3

    # Pad nodes only up to tile granularity (no extra padding).
    N_PAD = _round_up(N_NODES, LANE)

    key = jax.random.PRNGKey(0)
    key, kx = jax.random.split(key)

    # Node features (N, n_in).
    x = jax.random.normal(kx, (N_NODES, N_IN), jnp.float32)

    # batch assignment: first 8 nodes -> graph 0, last 8 -> graph 1.
    batch = jnp.array([0] * 8 + [1] * 8, dtype=jnp.int32)

    # Undirected ring edges within each graph (both directions).
    edges = []
    for g in range(N_GRAPHS):
        base = g * 8
        for i in range(8):
            a, b = base + i, base + (i + 1) % 8
            edges.append((a, b))
            edges.append((b, a))
    edge_index = jnp.array(edges, dtype=jnp.int32).T  # (2, E)

    a_hat = build_normalized_adjacency(edge_index, N_NODES)
    pool_mat = build_mean_pool_matrix(batch, N_GRAPHS)

    # Pad node dim to tile granularity and feature dims to 128 lanes; cast the
    # streamed operands (A_hat, X, pooling matrix, weights) to bf16.
    a_hat_pad = _pad2d(a_hat, N_PAD, N_PAD).astype(jnp.bfloat16)
    x_pad = _pad2d(x, N_PAD, _round_up(N_IN, LANE)).astype(jnp.bfloat16)
    pool_pad = _pad2d(pool_mat, N_GRAPHS, N_PAD).astype(jnp.bfloat16)

    params = init_params(key, N_IN, N_HIDDEN, N_OUT)

    out_pad = gcn_forward(params, x_pad, a_hat_pad, pool_pad)
    out = out_pad[:, :N_OUT]  # strip lane padding of the output dim
    out = jax.block_until_ready(out)

    assert out.shape == (N_GRAPHS, N_OUT)
    assert jnp.all(jnp.isfinite(out))

    # Numerical sanity check against a plain-JAX f32 reference (generous
    # tolerance: bf16 activation rounding across 5 layers).
    ref = reference_forward(params, x_pad, a_hat_pad, pool_pad)[:, :N_OUT]
    max_err = float(jnp.max(jnp.abs(out - ref)))
    scale = float(jnp.max(jnp.abs(ref)))
    assert max_err <= 5e-2 * scale + 1e-3, (max_err, scale)

    print("KERNEL_OK")
</pallas_src>

<mosaic_0001>
module attributes {stable_mosaic.version = 11 : i64} {
  func.func @gcn_layer_kernel(%arg0: i32, %arg1: i32, %arg2: memref<1x1xi32, #tpu.memory_space<smem>>, %arg3: memref<128x128xbf16, #tpu.memory_space<vmem>>, %arg4: memref<128x128xbf16, #tpu.memory_space<vmem>>, %arg5: memref<128x128xbf16, #tpu.memory_space<vmem>>, %arg6: memref<1x128xf32, #tpu.memory_space<vmem>>, %arg7: memref<128x128xbf16, #tpu.memory_space<vmem>>, %arg8: memref<128x128xf32, #tpu.memory_space<vmem>>) attributes {dimension_semantics = [#tpu.dimension_semantics<parallel>, #tpu.dimension_semantics<arbitrary>], iteration_bounds = array<i64: 1, 1>, scalar_prefetch = 1 : i64, scratch_operands = 1 : i64, tpu.core_type = #tpu.core_type<tc>, window_params = [{transform_indices = @transform_0, window_bounds = array<i64: 128, 128>}, {transform_indices = @transform_1, window_bounds = array<i64: 128, 128>}, {pipeline_mode = #tpu.pipeline_mode<synchronous>, transform_indices = @transform_2, window_bounds = array<i64: 128, 128>}, {pipeline_mode = #tpu.pipeline_mode<synchronous>, transform_indices = @transform_3, window_bounds = array<i64: 1, 128>}, {transform_indices = @transform_4, window_bounds = array<i64: 128, 128>}]} {
    %c0_i32 = arith.constant 0 : i32
    %0 = arith.cmpi eq, %arg1, %c0_i32 : i32
    %1 = arith.extui %0 : i1 to i32
    %c0_i32_0 = arith.constant 0 : i32
    %2 = arith.cmpi ne, %1, %c0_i32_0 : i32
    scf.if %2 {
      %cst_10 = arith.constant 0.000000e+00 : f32
      %12 = vector.broadcast %cst_10 : f32 to vector<128x128xf32>
      %c0_11 = arith.constant 0 : index
      %c0_12 = arith.constant 0 : index
      %13 = vector.load %arg8[%c0_11, %c0_12] : memref<128x128xf32, #tpu.memory_space<vmem>>, vector<128x128xf32>
      tpu.vector_store %arg8[%c0_11, %c0_12], %12 {strides = array<i32>} : memref<128x128xf32, #tpu.memory_space<vmem>>, vector<128x128xf32>,
    } else {
    }
    %c0 = arith.constant 0 : index
    %c0_1 = arith.constant 0 : index
    %3 = vector.load %arg8[%c0, %c0_1] : memref<128x128xf32, #tpu.memory_space<vmem>>, vector<128x128xf32>
    %c0_2 = arith.constant 0 : index
    %c0_3 = arith.constant 0 : index
    %4 = vector.load %arg3[%c0_2, %c0_3] : memref<128x128xbf16, #tpu.memory_space<vmem>>, vector<128x128xbf16>
    %c0_4 = arith.constant 0 : index
    %c0_5 = arith.constant 0 : index
    %5 = vector.load %arg4[%c0_4, %c0_5] : memref<128x128xbf16, #tpu.memory_space<vmem>>, vector<128x128xbf16>
    %cst = arith.constant dense<0.000000e+00> : vector<128x128xf32>
    %6 = tpu.matmul %4, %5, %cst {dimension_numbers = #tpu.dot_dimension_numbers<[1], [0], [0], [1], [0, 0, 1, 1], [], []>} : vector<128x128xbf16>, vector<128x128xbf16>, vector<128x128xf32> -> vector<128x128xf32>
    %7 = arith.addf %3, %6 : vector<128x128xf32>
    %c0_6 = arith.constant 0 : index
    %c0_7 = arith.constant 0 : index
    %8 = vector.load %arg8[%c0_6, %c0_7] : memref<128x128xf32, #tpu.memory_space<vmem>>, vector<128x128xf32>
    tpu.vector_store %arg8[%c0_6, %c0_7], %7 {strides = array<i32>} : memref<128x128xf32, #tpu.memory_space<vmem>>, vector<128x128xf32>,
    %c0_i32_8 = arith.constant 0 : i32
    %9 = arith.cmpi eq, %arg1, %c0_i32_8 : i32
    %10 = arith.extui %9 : i1 to i32
    %c0_i32_9 = arith.constant 0 : i32
    %11 = arith.cmpi ne, %10, %c0_i32_9 : i32
    scf.if %11 {
      %c0_10 = arith.constant 0 : index
      %c0_11 = arith.constant 0 : index
      %12 = vector.load %arg8[%c0_10, %c0_11] : memref<128x128xf32, #tpu.memory_space<vmem>>, vector<128x128xf32>
      %13 = arith.truncf %12 : vector<128x128xf32> to vector<128x128xbf16>
      %c0_12 = arith.constant 0 : index
      %c0_13 = arith.constant 0 : index
      %14 = vector.load %arg5[%c0_12, %c0_13] : memref<128x128xbf16, #tpu.memory_space<vmem>>, vector<128x128xbf16>
      %cst_14 = arith.constant dense<0.000000e+00> : vector<128x128xf32>
      %15 = tpu.matmul %13, %14, %cst_14 {dimension_numbers = #tpu.dot_dimension_numbers<[1], [0], [0], [1], [0, 0, 1, 1], [], []>} : vector<128x128xbf16>, vector<128x128xbf16>, vector<128x128xf32> -> vector<128x128xf32>
      %c0_15 = arith.constant 0 : index
      %c0_16 = arith.constant 0 : index
      %16 = vector.load %arg6[%c0_15, %c0_16] : memref<1x128xf32, #tpu.memory_space<vmem>>, vector<1x128xf32>
      %17 = vector.broadcast %16 : vector<1x128xf32> to vector<128x128xf32>
      %18 = arith.addf %15, %17 : vector<128x128xf32>
      %cst_17 = arith.constant 0.000000e+00 : f32
      %19 = vector.broadcast %cst_17 : f32 to vector<128x128xf32>
      %20 = arith.maximumf %18, %19 : vector<128x128xf32>
      %21 = arith.truncf %20 : vector<128x128xf32> to vector<128x128xbf16>
      %c0_18 = arith.constant 0 : index
      %c0_19 = arith.constant 0 : index
      %22 = vector.load %arg7[%c0_18, %c0_19] : memref<128x128xbf16, #tpu.memory_space<vmem>>, vector<128x128xbf16>
      tpu.vector_store %arg7[%c0_18, %c0_19], %21 {strides = array<i32>} : memref<128x128xbf16, #tpu.memory_space<vmem>>, vector<128x128xbf16>,
    } else {
    }
    return
  }
  func.func @transform_0(%arg0: i32, %arg1: i32, %arg2: memref<1x1xi32, #tpu.memory_space<smem>>) -> (i32, i32) {
    %0 = arith.index_cast %arg0 : i32 to index
    %1 = arith.index_cast %arg1 : i32 to index
    %2 = memref.load %arg2[%0, %1] : memref<1x1xi32, #tpu.memory_space<smem>>
    %c0_i32 = arith.constant 0 : i32
    return %arg0, %2 : i32, i32
  }
  func.func @transform_1(%arg0: i32, %arg1: i32, %arg2: memref<1x1xi32, #tpu.memory_space<smem>>) -> (i32, i32) {
    %0 = arith.index_cast %arg0 : i32 to index
    %1 = arith.index_cast %arg1 : i32 to index
    %2 = memref.load %arg2[%0, %1] : memref<1x1xi32, #tpu.memory_space<smem>>
    %c0_i32 = arith.constant 0 : i32
    %c0_i32_0 = arith.constant 0 : i32
    return %2, %c0_i32 : i32, i32
  }
  func.func @transform_2(%arg0: i32, %arg1: i32, %arg2: memref<1x1xi32, #tpu.memory_space<smem>>) -> (i32, i32) {
    %c0_i32 = arith.constant 0 : i32
    %c0_i32_0 = arith.constant 0 : i32
    %c0_i32_1 = arith.constant 0 : i32
    return %c0_i32, %c0_i32_0 : i32, i32
  }
  func.func @transform_3(%arg0: i32, %arg1: i32, %arg2: memref<1x1xi32, #tpu.memory_space<smem>>) -> (i32, i32) {
    %c0_i32 = arith.constant 0 : i32
    %c0_i32_0 = arith.constant 0 : i32
    %c0_i32_1 = arith.constant 0 : i32
    return %c0_i32, %c0_i32_0 : i32, i32
  }
  func.func @transform_4(%arg0: i32, %arg1: i32, %arg2: memref<1x1xi32, #tpu.memory_space<smem>>) -> (i32, i32) {
    %c0_i32 = arith.constant 0 : i32
    %c0_i32_0 = arith.constant 0 : i32
    return %arg0, %c0_i32 : i32, i32
  }
}

</mosaic_0001>

<bundles_post_ra>
// kernel: tpu_custom_call.1
= control target key start
LH: loop header
LB: loop body
LE: loop exit
PB: predicated region body
PF: predicated region fallthrough
CT: control target
= control target key end

     0   :  { %11 = vsyncpa [#allocation6], 0  ;;  %s1121_s0 = inlined_call_operand.<no memory space> [shape: s32[1,1], index: 0, kind: input, shape index: {}]   ;;  %s1122_s1 = inlined_call_operand.hbm [shape: bf16[128,128], index: 1, kind: input, shape index: {}]   ;;  %s1123_s2 = inlined_call_operand.hbm [shape: bf16[128,128], index: 2, kind: input, shape index: {}]   ;;  %s1124_s3 = inlined_call_operand.hbm [shape: bf16[128,128], index: 3, kind: input, shape index: {}]   ;;  %s1125_s4 = inlined_call_operand.vmem [shape: f32[1,128], index: 4, kind: input, shape index: {}]   ;;  %s1126_s5 = inlined_call_operand.hbm [shape: bf16[128,128], index: 5, kind: output, shape index: {}]  }
   0x1   :  { %12 = vsyncpa [#allocation9], 0 }
   0x2   :  { %13 = vsyncpa [#allocation7], 0  ;;  %s734_s20 = sshll.u32 %s1121_s0, 10  ;;  %s1022_s24 = smov [#allocation8]  }
   0x3   :  { %s43_s23 = scalar_lea.hbm %s1123_s2, %s734_s20  ;;  %s44_s25 = sshll.u32 %s1022_s24, 4  ;;  %s45_s25 = int_to_ptr.vmem [resolvable:$true] %s44_s25 }
   0x4   :  { %s690_s28 = sshll.u32 %s1121_s0, 6  ;;  %s924_s29 = scalar_lea.hbm %s43_s23, 1024 }
   0x5   :  { %p925_p0 = scmp.ne.s32.totalorder %s43_s23, %s924_s29  ;;  %s926_s7 = scalar_lea.hbm %s1123_s2, 1024 }
   0x6   :  { %p927_p1 = scmp.lt.u32.totalorder %s43_s23, %s1123_s2  ;;  %p928_p2 = scmp.lt.u32.totalorder %s926_s7, %s924_s29 }
   0x7   :  { %p930_p4 = scmp.lt.u32.totalorder %s924_s29, %s43_s23 }
   0x8   :  { %p929_p3 = por %p928_p2, %p927_p1 }
   0xa   :  { %p931_p5 = por %p930_p4, %p929_p3 }
   0xc   :  { %p932_p6 = pnand %p931_p5, %p925_p0 }
   0xe   :  { %935 = shalt.err (!%p932_p6)
}
   0xf   :  { %s936_s10 = scalar_lea.vmem %s45_s25, 1024  ;;  %p941_p8 = scmp.lt.s32.totalorder %s45_s25, %s45_s25 }
  0x10   :  { %p937_p7 = scmp.ne.s32.totalorder %s45_s25, %s936_s10  ;;  %p942_p9 = scmp.lt.s32.totalorder %s936_s10, %s936_s10 }
  0x12   :  { %p943_p10 = por %p942_p9, %p941_p8 }
  0x14   :  { %p944_p11 = pnand %p943_p10, %p937_p7 }
  0x16   :  { %947 = shalt.err (!%p944_p11)
}
  0x17   :  { %s1023_s0 = smov 64   ;;  %s1024_s11 = smov 4  }
  0x18   :  { %50 = dma.hbm_to_vmem [thread:$0]  %s43_s23, 1024, %s45_s25, [#allocation9], %s1023_s0, %s1023_s0, %s1024_s11  }
  0x19   :  { %s24_s13 = scalar_lea.hbm %s1122_s1, %s690_s28  ;;  %s1025_s14 = smov [#allocation5]  }
  0x1a   :  { %s25_s15 = sshll.u32 %s1025_s14, 4  ;;  %s1026_s16 = smov [#allocation10]   ;;  %s26_s15 = int_to_ptr.vmem [resolvable:$true] %s25_s15 }
  0x1b   :  { %s56_s17 = sshll.u32 %s1026_s16, 4  ;;  %s948_s18 = scalar_lea.hbm %s24_s13, 1024  ;;  %s57_s17 = int_to_ptr.vmem [resolvable:$true] %s56_s17 }
  0x1c   :  { %p949_p12 = scmp.ne.s32.totalorder %s24_s13, %s948_s18  ;;  %s950_s21 = scalar_lea.hbm %s1122_s1, 1024 }
  0x1d   :  { %p951_p13 = scmp.lt.u32.totalorder %s24_s13, %s1122_s1  ;;  %p952_p0 = scmp.lt.u32.totalorder %s950_s21, %s948_s18 }
  0x1e   :  { %p954_p2 = scmp.lt.u32.totalorder %s948_s18, %s24_s13 }
  0x1f   :  { %p953_p1 = por %p952_p0, %p951_p13 }
  0x21   :  { %p955_p3 = por %p954_p2, %p953_p1 }
  0x23   :  { %p956_p4 = pnand %p955_p3, %p949_p12 }
  0x25   :  { %959 = shalt.err (!%p956_p4)
}
  0x26   :  { %s960_s23 = scalar_lea.vmem %s26_s15, 1024  ;;  %p965_p6 = scmp.lt.s32.totalorder %s26_s15, %s26_s15 }
  0x27   :  { %p961_p5 = scmp.ne.s32.totalorder %s26_s15, %s960_s23  ;;  %p966_p7 = scmp.lt.s32.totalorder %s960_s23, %s960_s23 }
  0x29   :  { %p967_p8 = por %p966_p7, %p965_p6 }
  0x2b   :  { %p968_p9 = pnand %p967_p8, %p961_p5 }
  0x2d   :  { %971 = shalt.err (!%p968_p9)
}
  0x2e   :  { %31 = dma.hbm_to_vmem [thread:$0]  %s24_s13, 1024, %s26_s15, [#allocation6], %s1023_s0, %s1023_s0, %s1024_s11  }
  0x2f   :  { %s972_s26 = scalar_lea.hbm %s1124_s3, 1024 }
  0x30   :  { %p973_p10 = scmp.ne.s32.totalorder %s1124_s3, %s972_s26  ;;  %p976_p11 = scmp.lt.u32.totalorder %s972_s26, %s1124_s3 }
  0x32   :  { %p978_p12 = pnand %p976_p11, %p973_p10 }
  0x34   :  { %981 = shalt.err (!%p978_p12)
}
  0x35   :  { %s982_s6 = scalar_lea.vmem %s57_s17, 1024  ;;  %p987_p0 = scmp.lt.s32.totalorder %s57_s17, %s57_s17 }
  0x36   :  { %p983_p13 = scmp.ne.s32.totalorder %s57_s17, %s982_s6  ;;  %p988_p1 = scmp.lt.s32.totalorder %s982_s6, %s982_s6 }
  0x38   :  { %p989_p2 = por %p988_p1, %p987_p0 }
  0x3a   :  { %p990_p3 = pnand %p989_p2, %p983_p13 }
  0x3c   :  { %993 = shalt.err (!%p990_p3)
}
  0x3d   :  { %62 = dma.hbm_to_vmem [thread:$0]  %s1124_s3, 1024, %s57_s17, [#allocation9], %s1023_s0, %s1023_s0, %s1024_s11  }
  0x3e   :  { %1016 = dma.done.wait [#allocation6], 1024  }
  0x3f   :  { %1017 = vsyncadd [#allocation6], 4294966272 }
  0x40   :  { %1018 = dma.done.wait [#allocation9], 2048  }
  0x41   :  { %1019 = vsyncadd [#allocation9], 4294965248  ;;  %v900_v0 = vld [vmem:[#allocation8] sm:$0xff]   ;;  %v901_v1 = vld [vmem:[#allocation8 + $0x8] sm:$0xff]  }
  0x42   :  { %830 = vmatprep.subr.bf16.mxu0 %v900_v0  ;;  %v902_v2 = vld [vmem:[#allocation8 + $0x10] sm:$0xff]   ;;  %v903_v3 = vld [vmem:[#allocation8 + $0x18] sm:$0xff]   ;;  %v908_v4 = vld [vmem:[#allocation5] sm:$0xff]  }
  0x43   :  { %831 = vmatpush3.bf16.msra.mxu0 %v900_v0  ;;  %846 = vmatprep.mubr.bf16.mxu0 %v908_v4  ;;  %v904_v5 = vld [vmem:[#allocation8 + $0x20] sm:$0xff]   ;;  %v905_v6 = vld [vmem:[#allocation8 + $0x28] sm:$0xff]   ;;  %v906_v9 = vld [vmem:[#allocation8 + $0x30] sm:$0xff]  }
  0x44   :  { %832 = vmatprep.subr.bf16.mxu0 %v901_v1  ;;  %v916_v7 = vld [vmem:[#allocation10] sm:$0xff]   ;;  %v917_v8 = vld [vmem:[#allocation10 + $0x8] sm:$0xff]   ;;  %v918_v10 = vld [vmem:[#allocation10 + $0x10] sm:$0xff]  }
  0x45   :  { %862 = vmatprep.subr.bf16.mxu1 %v916_v7  ;;  %v907_v11 = vld [vmem:[#allocation8 + $0x38] sm:$0xff]   ;;  %v920_v13 = vld [vmem:[#allocation10 + $0x20] sm:$0xff]   ;;  %v909_v14 = vld [vmem:[#allocation5 + $0x8] sm:$0xff]  }
  0x46   :  { %863 = vmatpush3.bf16.msra.mxu1 %v916_v7  ;;  %v919_v12 = vld [vmem:[#allocation10 + $0x18] sm:$0xff]   ;;  %v910_v15 = vld [vmem:[#allocation5 + $0x10] sm:$0xff]   ;;  %v921_v16 = vld [vmem:[#allocation10 + $0x28] sm:$0xff]  }
  0x47   :  { %833 = vmatpush3.bf16.msra.mxu0 %v901_v1  ;;  %864 = vmatprep.subr.bf16.mxu1 %v917_v8  ;;  %v922_v17 = vld [vmem:[#allocation10 + $0x30] sm:$0xff]   ;;  %v911_v18 = vld [vmem:[#allocation5 + $0x18] sm:$0xff]   ;;  %v912_v19 = vld [vmem:[#allocation5 + $0x20] sm:$0xff]  }
  0x48   :  { %834 = vmatprep.subr.bf16.mxu0 %v902_v2  ;;  %v913_v20 = vld [vmem:[#allocation5 + $0x28] sm:$0xff]   ;;  %v914_v21 = vld [vmem:[#allocation5 + $0x30] sm:$0xff]   ;;  %v915_v22 = vld [vmem:[#allocation5 + $0x38] sm:$0xff]  }
  0x49   :  { %v923_v23 = vld [vmem:[#allocation10 + $0x38] sm:$0xff]   ;;  %v709_v48 = vld [vmem:[%s1125_s4] ss:$0 sm:$0xff]  ;;  %s1027_s4 = smov [#allocation11]  }
  0x4a   :  { %865 = vmatpush3.bf16.msra.mxu1 %v917_v8  ;;  %s673_s10 = sshll.u32 %s1027_s4, 4  ;;  %s674_s10 = int_to_ptr.vmem [resolvable:$true] %s673_s10 }
  0x4b   :  { %835 = vmatpush3.bf16.msra.mxu0 %v902_v2  ;;  %866 = vmatprep.subr.bf16.mxu1 %v918_v10  ;;  %s994_s2 = scalar_lea.vmem %s674_s10, 1024  ;;  %p999_p5 = scmp.lt.s32.totalorder %s674_s10, %s674_s10 }
  0x4c   :  { %836 = vmatprep.subr.bf16.mxu0 %v903_v3  ;;  %p995_p4 = scmp.ne.s32.totalorder %s674_s10, %s994_s2  ;;  %p1000_p6 = scmp.lt.s32.totalorder %s994_s2, %s994_s2 }
  0x4e   :  { %867 = vmatpush3.bf16.msra.mxu1 %v918_v10  ;;  %p1001_p7 = por %p1000_p6, %p999_p5 }
  0x4f   :  { %837 = vmatpush3.bf16.msra.mxu0 %v903_v3  ;;  %868 = vmatprep.subr.bf16.mxu1 %v919_v12 }
  0x50   :  { %838 = vmatprep.subr.bf16.mxu0 %v904_v5  ;;  %p1002_p8 = pnand %p1001_p7, %p995_p4 }
  0x52   :  { %869 = vmatpush3.bf16.msra.mxu1 %v919_v12 }
  0x53   :  { %839 = vmatpush3.bf16.msra.mxu0 %v904_v5  ;;  %870 = vmatprep.subr.bf16.mxu1 %v920_v13 }
  0x54   :  { %840 = vmatprep.subr.bf16.mxu0 %v905_v6 }
  0x56   :  { %871 = vmatpush3.bf16.msra.mxu1 %v920_v13 }
  0x57   :  { %841 = vmatpush3.bf16.msra.mxu0 %v905_v6  ;;  %872 = vmatprep.subr.bf16.mxu1 %v921_v16 }
  0x58   :  { %842 = vmatprep.subr.bf16.mxu0 %v906_v9 }
  0x5a   :  { %873 = vmatpush3.bf16.msra.mxu1 %v921_v16 }
  0x5b   :  { %843 = vmatpush3.bf16.msra.mxu0 %v906_v9  ;;  %874 = vmatprep.subr.bf16.mxu1 %v922_v17 }
  0x5c   :  { %844 = vmatprep.subr.bf16.mxu0 %v907_v11 }
  0x5e   :  { %875 = vmatpush3.bf16.msra.mxu1 %v922_v17 }
  0x5f   :  { %845 = vmatpush3.bf16.msra.mxu0 %v907_v11  ;;  %876 = vmatprep.subr.bf16.mxu1 %v923_v23 }
  0x62   :  { %847 = vmatmul.mubr.bf16.vlgmr.msra.gmra.mrb[0].mxu0 %v909_v14  ;;  %877 = vmatpush3.bf16.msra.mxu1 %v923_v23 }
  0x63   :  { %850 = vmatprep.mubr.bf16.mxu0 %v910_v15 }
  0x6a   :  { %851 = vmatmul.mubr.bf16.gmra.mrb[4].mxu0 %v911_v18 }
  0x6b   :  { %854 = vmatprep.mubr.bf16.mxu0 %v912_v19 }
  0x72   :  { %855 = vmatmul.mubr.bf16.gmra.mrb[8].mxu0 %v913_v20 }
  0x73   :  { %858 = vmatprep.mubr.bf16.mxu0 %v914_v21 }
  0x7a   :  { %859 = vmatmul.mubr.bf16.gmra.mrb[12].mxu0 %v915_v22 }
 0x135   :  { %v848_v24 = vpop.f32.mrb[0].mxu0 }
 0x136   :  { %v282_v25 = vpop.f32.mrb[1].mxu0 }
 0x137   :  { %v849_v26 = vpop.f32.mrb[2].mxu0 }
 0x138   :  { %v397_v27 = vpack.c.bf16 %v849_v26, %v848_v24  ;;  %v285_v28 = vpop.f32.mrb[3].mxu0 }
 0x139   :  { %v396_v29 = vpack.c.bf16 %v285_v28, %v282_v25 }
 0x13b   :  { %878 = vmatprep.mubr.bf16.mxu1 %v396_v29 }
 0x13c   :  { %879 = vmatmul.mubr.bf16.vlgmr.msra.gmra.mrb[0].mxu1 %v397_v27 }
 0x13d   :  { %v852_v30 = vpop.f32.mrb[4].mxu0 }
 0x13e   :  { %v298_v31 = vpop.f32.mrb[5].mxu0 }
 0x13f   :  { %v853_v32 = vpop.f32.mrb[6].mxu0 }
 0x140   :  { %v399_v33 = vpack.c.bf16 %v853_v32, %v852_v30  ;;  %v301_v34 = vpop.f32.mrb[7].mxu0 }
 0x141   :  { %v398_v35 = vpack.c.bf16 %v301_v34, %v298_v31 }
 0x143   :  { %882 = vmatprep.mubr.bf16.mxu1 %v398_v35 }
 0x144   :  { %883 = vmatmul.mubr.bf16.gmra.mrb[4].mxu1 %v399_v33 }
 0x145   :  { %v856_v36 = vpop.f32.mrb[8].mxu0 }
 0x146   :  { %v314_v37 = vpop.f32.mrb[9].mxu0 }
 0x147   :  { %v857_v38 = vpop.f32.mrb[10].mxu0 }
 0x148   :  { %v401_v39 = vpack.c.bf16 %v857_v38, %v856_v36  ;;  %v317_v40 = vpop.f32.mrb[11].mxu0 }
 0x149   :  { %v400_v41 = vpack.c.bf16 %v317_v40, %v314_v37 }
 0x14b   :  { %886 = vmatprep.mubr.bf16.mxu1 %v400_v41 }
 0x14c   :  { %887 = vmatmul.mubr.bf16.gmra.mrb[8].mxu1 %v401_v39 }
 0x14d   :  { %v860_v42 = vpop.f32.mrb[12].mxu0 }
 0x14e   :  { %v330_v43 = vpop.f32.mrb[13].mxu0 }
 0x14f   :  { %v861_v44 = vpop.f32.mrb[14].mxu0 }
 0x150   :  { %v403_v45 = vpack.c.bf16 %v861_v44, %v860_v42  ;;  %v333_v46 = vpop.f32.mrb[15].mxu0 }
 0x151   :  { %v402_v47 = vpack.c.bf16 %v333_v46, %v330_v43 }
 0x153   :  { %890 = vmatprep.mubr.bf16.mxu1 %v402_v47 }
 0x154   :  { %891 = vmatmul.mubr.bf16.gmra.mrb[12].mxu1 %v403_v45 }
 0x20f   :  { %v880_v49 = vpop.f32.mrb[0].mxu1 }
 0x210   :  { %v518_v50 = vadd.f32 %v880_v49, %v709_v48  ;;  %v509_v51 = vpop.f32.mrb[1].mxu1 }
 0x211   :  { %v510_v52 = vadd.f32 %v709_v48, %v509_v51  ;;  %v881_v53 = vpop.f32.mrb[2].mxu1 }
 0x212   :  { %v521_v54 = vadd.f32 %v881_v53, %v709_v48  ;;  %v512_v55 = vpop.f32.mrb[3].mxu1  ;;  %v574_v57 = vmax.f32 %v518_v50, 0.0 }
 0x213   :  { %v513_v56 = vadd.f32 %v709_v48, %v512_v55  ;;  %v572_v59 = vmax.f32 %v510_v52, 0.0 }
 0x214   :  { %v575_v58 = vmax.f32 %v521_v54, 0.0 }
 0x215   :  { %v573_v60 = vmax.f32 %v513_v56, 0.0 }
 0x216   :  { %v759_v61 = vpack.c.bf16 %v575_v58, %v574_v57 }
 0x217   :  { %v754_v62 = vpack.c.bf16 %v573_v60, %v572_v59  ;;  %v884_v63 = vpop.f32.mrb[4].mxu1 }
 0x218   :  { %791 = vst [vmem:[#allocation11 + $0x8] sm:$0xff] %v759_v61   ;;  %v534_v0 = vadd.f32 %v884_v63, %v709_v48  ;;  %v525_v1 = vpop.f32.mrb[5].mxu1 }
 0x219   :  { %755 = vst [vmem:[#allocation11] sm:$0xff] %v754_v62   ;;  %v526_v2 = vadd.f32 %v709_v48, %v525_v1  ;;  %v885_v3 = vpop.f32.mrb[6].mxu1 }
 0x21a   :  { %v537_v4 = vadd.f32 %v885_v3, %v709_v48  ;;  %v528_v5 = vpop.f32.mrb[7].mxu1  ;;  %v578_v7 = vmax.f32 %v534_v0, 0.0 }
 0x21b   :  { %v529_v6 = vadd.f32 %v709_v48, %v528_v5  ;;  %v576_v9 = vmax.f32 %v526_v2, 0.0 }
 0x21c   :  { %v579_v8 = vmax.f32 %v537_v4, 0.0 }
 0x21d   :  { %v577_v10 = vmax.f32 %v529_v6, 0.0 }
 0x21e   :  { %v769_v11 = vpack.c.bf16 %v579_v8, %v578_v7 }
 0x21f   :  { %v764_v12 = vpack.c.bf16 %v577_v10, %v576_v9  ;;  %v888_v13 = vpop.f32.mrb[8].mxu1 }
 0x220   :  { %793 = vst [vmem:[#allocation11 + $0x18] sm:$0xff] %v769_v11   ;;  %v550_v14 = vadd.f32 %v888_v13, %v709_v48  ;;  %v541_v15 = vpop.f32.mrb[9].mxu1 }
 0x221   :  { %792 = vst [vmem:[#allocation11 + $0x10] sm:$0xff] %v764_v12   ;;  %v542_v16 = vadd.f32 %v709_v48, %v541_v15  ;;  %v889_v17 = vpop.f32.mrb[10].mxu1 }
 0x222   :  { %v553_v18 = vadd.f32 %v889_v17, %v709_v48  ;;  %v544_v19 = vpop.f32.mrb[11].mxu1  ;;  %v582_v21 = vmax.f32 %v550_v14, 0.0 }
 0x223   :  { %v545_v20 = vadd.f32 %v709_v48, %v544_v19  ;;  %v580_v23 = vmax.f32 %v542_v16, 0.0 }
 0x224   :  { %v583_v22 = vmax.f32 %v553_v18, 0.0 }
 0x225   :  { %v581_v24 = vmax.f32 %v545_v20, 0.0 }
 0x226   :  { %v779_v25 = vpack.c.bf16 %v583_v22, %v582_v21 }
 0x227   :  { %v774_v26 = vpack.c.bf16 %v581_v24, %v580_v23  ;;  %v892_v27 = vpop.f32.mrb[12].mxu1 }
 0x228   :  { %795 = vst [vmem:[#allocation11 + $0x28] sm:$0xff] %v779_v25   ;;  %v566_v28 = vadd.f32 %v892_v27, %v709_v48  ;;  %v557_v29 = vpop.f32.mrb[13].mxu1 }
 0x229   :  { %794 = vst [vmem:[#allocation11 + $0x20] sm:$0xff] %v774_v26   ;;  %v558_v30 = vadd.f32 %v709_v48, %v557_v29  ;;  %v893_v31 = vpop.f32.mrb[14].mxu1 }
 0x22a   :  { %v569_v32 = vadd.f32 %v893_v31, %v709_v48  ;;  %v560_v33 = vpop.f32.mrb[15].mxu1  ;;  %v586_v35 = vmax.f32 %v566_v28, 0.0 }
 0x22b   :  { %v561_v34 = vadd.f32 %v709_v48, %v560_v33  ;;  %v584_v37 = vmax.f32 %v558_v30, 0.0 }
 0x22c   :  { %v587_v36 = vmax.f32 %v569_v32, 0.0 }
 0x22d   :  { %v585_v38 = vmax.f32 %v561_v34, 0.0 }
 0x22e   :  { %v789_v39 = vpack.c.bf16 %v587_v36, %v586_v35 }
 0x22f   :  { %v784_v40 = vpack.c.bf16 %v585_v38, %v584_v37 }
 0x230   :  { %797 = vst [vmem:[#allocation11 + $0x38] sm:$0xff] %v789_v39  }
 0x231   :  { %796 = vst [vmem:[#allocation11 + $0x30] sm:$0xff] %v784_v40  }
 0x232   :  { %1005 = shalt.err (!%p1002_p8)
}
 0x233   :  { %s1006_s14 = scalar_lea.hbm %s1126_s5, 1024 }
 0x234   :  { %p1007_p9 = scmp.ne.s32.totalorder %s1126_s5, %s1006_s14  ;;  %p1010_p10 = scmp.lt.u32.totalorder %s1006_s14, %s1126_s5 }
 0x236   :  { %p1012_p11 = pnand %p1010_p10, %p1007_p9 }
 0x238   :  { %1015 = shalt.err (!%p1012_p11)
}
 0x239   :  { %679 = dma.vmem_to_hbm [thread:$0]  %s674_s10, 1024, %s1126_s5, [#allocation7], %s1023_s0, %s1023_s0, %s1024_s11  }
 0x23a   :  { %1020 = dma.done.wait [#allocation7], 1024  }
 0x23b   :  { %1021 = vsyncadd [#allocation7], 4294966272 }
 0x23c   :  { %683 = vsyncpa [#allocation6], 1 }
 0x23d   :  { %684 = vsyncpa [#allocation9], 1 }
 0x23e   :  { %685 = vsyncpa [#allocation7], 1 }

</bundles_post_ra>
